<compile_context>
chip_gen: v6e
topology: v6e:2x2x1
jax: 0.10.0
libtpu: 0.0.40
codegen_flags: <defaults>
</compile_context>

<pallas_src>
import jax
import jax.numpy as jnp
from jax.experimental import pallas as pl
from jax.experimental.pallas import tpu as pltpu

# ---- static configuration ---------------------------------------------------
C_IN = 3          # RGB channels (as in the PyTorch module)
H = W = 16
HW = H * W        # 256 -> lane axis, multiple of 128
BATCH = 2
NUM_STEPS = 4     # synthetic reverse-diffusion steps
BETAS = (0.10, 0.08, 0.06, 0.04)
ALPHAS = tuple(1.0 / (1.0 - b) ** 0.5 for b in BETAS)  # deterministic scales


# ---- Pallas kernel ----------------------------------------------------------
def sde_adv_purify_kernel(x_ref, w_ref, b_ref, o_ref):
    """Purification as an unrolled VPU FMA chain (no MXU, no extra DMAs).

    x_ref: (B, C, HW) VMEM f32, images in [0,1]; lane axis = HW (256).
    w_ref: (C*C,)     SMEM f32, folded channel-mixing matrix (row-major).
    b_ref: (C,)       SMEM f32, folded per-channel bias.
    o_ref: (B, C, HW) VMEM f32, purified images in [0,1].

    out[b, i, :] = sum_j w[i, j] * x[b, j, :] + bias[i]
    """
    nb, nc, _ = x_ref.shape
    for b in range(nb):                       # static unroll over batch
        for i in range(nc):                   # static unroll over out channels
            acc = x_ref[b, 0:1, :] * w_ref[i * nc + 0]
            for j in range(1, nc):            # static unroll over in channels
                acc = acc + x_ref[b, j:j + 1, :] * w_ref[i * nc + j]
            o_ref[b, i:i + 1, :] = acc + b_ref[i]


# ---- wrapper ----------------------------------------------------------------
def _fold_purify_affine(w_mix):
    """Fold rescale -> NUM_STEPS linear reverse-diffusion steps -> rescale.

    out = 0.5 * (M @ (2x - 1)) + 0.5 = M @ x + 0.5 * (1 - M @ 1)
    with M = A_{T-1} ... A_1 A_0,  A_t = alpha_t * (I - beta_t * W).
    """
    eye = jnp.eye(C_IN, dtype=jnp.float32)
    m = eye
    for t in range(NUM_STEPS):
        m = (ALPHAS[t] * (eye - BETAS[t] * w_mix)) @ m
    bias = 0.5 * (1.0 - jnp.sum(m, axis=1))          # (C,)
    return m.reshape(-1), bias                        # (C*C,), (C,)


def sde_adv_model_purify(x_nchw, w_mix):
    """x_nchw: (B, 3, H, W) float32 in [0,1];  w_mix: (3, 3) score weight."""
    B, C, Hh, Ww = x_nchw.shape
    HWp = Hh * Ww

    w_flat, bias = _fold_purify_affine(w_mix)

    # free reshape only (no transpose, no data movement); lane axis = H*W
    x_flat = x_nchw.reshape(B, C, HWp)

    out = pl.pallas_call(
        sde_adv_purify_kernel,
        out_shape=jax.ShapeDtypeStruct((B, C, HWp), jnp.float32),
        in_specs=[
            pl.BlockSpec(memory_space=pltpu.MemorySpace.VMEM),   # image slab
            pl.BlockSpec(memory_space=pltpu.MemorySpace.SMEM),   # 9 weights
            pl.BlockSpec(memory_space=pltpu.MemorySpace.SMEM),   # 3 biases
        ],
        out_specs=pl.BlockSpec(memory_space=pltpu.MemorySpace.VMEM),
        cost_estimate=pl.CostEstimate(
            flops=2 * B * C * C * HWp,
            transcendentals=0,
            bytes_accessed=(2 * B * C * HWp + C * C + C) * 4),
    )(x_flat, w_flat, bias)

    return out.reshape(B, C, Hh, Ww)


# ---- pure-JAX reference (per-step loop, unfused) -----------------------------
def _purify_ref(x_nchw, w_mix):
    x = (x_nchw - 0.5) * 2.0                      # (B,3,H,W)
    for t in range(NUM_STEPS):
        eps = jnp.einsum("ij,bjhw->bihw", w_mix, x)
        x = (x - BETAS[t] * eps) * ALPHAS[t]
    return (x + 1.0) * 0.5


if __name__ == "__main__":
    key = jax.random.PRNGKey(0)
    kx, kw = jax.random.split(key)

    # deterministic example input (batch=2, C=3, 16x16, values in [0,1])
    x = jax.random.uniform(kx, (BATCH, C_IN, H, W), dtype=jnp.float32)
    # deterministic synthetic score-network weight (1x1 conv over channels)
    w_mix = (jnp.eye(C_IN, dtype=jnp.float32)
             + 0.05 * jax.random.normal(kw, (C_IN, C_IN), dtype=jnp.float32))

    out = sde_adv_model_purify(x, w_mix)
    out = jax.block_until_ready(out)

    ref = _purify_ref(x, w_mix)
    assert out.shape == (BATCH, C_IN, H, W)
    assert jnp.allclose(out, ref, atol=1e-5, rtol=1e-5), "mismatch vs reference"

    print("KERNEL_OK")
</pallas_src>

<mosaic_0001>
module attributes {stable_mosaic.version = 11 : i64} {
  func.func @sde_adv_purify_kernel(%arg0: memref<2x3x256xf32, #tpu.memory_space<vmem>>, %arg1: memref<9xf32, #tpu.memory_space<smem>>, %arg2: memref<3xf32, #tpu.memory_space<smem>>, %arg3: memref<2x3x256xf32, #tpu.memory_space<vmem>>) attributes {dimension_semantics = [], scalar_prefetch = 0 : i64, scratch_operands = 0 : i64, tpu.core_type = #tpu.core_type<tc>} {
    %c0 = arith.constant 0 : index
    %c0_0 = arith.constant 0 : index
    %c0_1 = arith.constant 0 : index
    %0 = vector.load %arg0[%c0, %c0_0, %c0_1] : memref<2x3x256xf32, #tpu.memory_space<vmem>>, vector<1x1x256xf32>
    %1 = vector.shape_cast %0 : vector<1x1x256xf32> to vector<1x256xf32>
    %c0_2 = arith.constant 0 : index
    %2 = memref.load %arg1[%c0_2] : memref<9xf32, #tpu.memory_space<smem>>
    %3 = vector.broadcast %2 : f32 to vector<1x256xf32>
    %4 = arith.mulf %1, %3 : vector<1x256xf32>
    %c0_3 = arith.constant 0 : index
    %c1 = arith.constant 1 : index
    %c0_4 = arith.constant 0 : index
    %5 = vector.load %arg0[%c0_3, %c1, %c0_4] : memref<2x3x256xf32, #tpu.memory_space<vmem>>, vector<1x1x256xf32>
    %6 = vector.shape_cast %5 : vector<1x1x256xf32> to vector<1x256xf32>
    %c1_5 = arith.constant 1 : index
    %7 = memref.load %arg1[%c1_5] : memref<9xf32, #tpu.memory_space<smem>>
    %8 = vector.broadcast %7 : f32 to vector<1x256xf32>
    %9 = arith.mulf %6, %8 : vector<1x256xf32>
    %10 = arith.addf %4, %9 : vector<1x256xf32>
    %c0_6 = arith.constant 0 : index
    %c2 = arith.constant 2 : index
    %c0_7 = arith.constant 0 : index
    %11 = vector.load %arg0[%c0_6, %c2, %c0_7] : memref<2x3x256xf32, #tpu.memory_space<vmem>>, vector<1x1x256xf32>
    %12 = vector.shape_cast %11 : vector<1x1x256xf32> to vector<1x256xf32>
    %c2_8 = arith.constant 2 : index
    %13 = memref.load %arg1[%c2_8] : memref<9xf32, #tpu.memory_space<smem>>
    %14 = vector.broadcast %13 : f32 to vector<1x256xf32>
    %15 = arith.mulf %12, %14 : vector<1x256xf32>
    %16 = arith.addf %10, %15 : vector<1x256xf32>
    %c0_9 = arith.constant 0 : index
    %17 = memref.load %arg2[%c0_9] : memref<3xf32, #tpu.memory_space<smem>>
    %18 = vector.broadcast %17 : f32 to vector<1x256xf32>
    %19 = arith.addf %16, %18 : vector<1x256xf32>
    %c0_10 = arith.constant 0 : index
    %c0_11 = arith.constant 0 : index
    %c0_12 = arith.constant 0 : index
    %20 = vector.load %arg3[%c0_10, %c0_11, %c0_12] : memref<2x3x256xf32, #tpu.memory_space<vmem>>, vector<1x1x256xf32>
    %21 = vector.shape_cast %20 : vector<1x1x256xf32> to vector<1x256xf32>
    %22 = vector.shape_cast %19 : vector<1x256xf32> to vector<1x1x256xf32>
    tpu.vector_store %arg3[%c0_10, %c0_11, %c0_12], %22 {strides = array<i32>} : memref<2x3x256xf32, #tpu.memory_space<vmem>>, vector<1x1x256xf32>,
    %c0_13 = arith.constant 0 : index
    %c0_14 = arith.constant 0 : index
    %c0_15 = arith.constant 0 : index
    %23 = vector.load %arg0[%c0_13, %c0_14, %c0_15] : memref<2x3x256xf32, #tpu.memory_space<vmem>>, vector<1x1x256xf32>
    %24 = vector.shape_cast %23 : vector<1x1x256xf32> to vector<1x256xf32>
    %c3 = arith.constant 3 : index
    %25 = memref.load %arg1[%c3] : memref<9xf32, #tpu.memory_space<smem>>
    %26 = vector.broadcast %25 : f32 to vector<1x256xf32>
    %27 = arith.mulf %24, %26 : vector<1x256xf32>
    %c0_16 = arith.constant 0 : index
    %c1_17 = arith.constant 1 : index
    %c0_18 = arith.constant 0 : index
    %28 = vector.load %arg0[%c0_16, %c1_17, %c0_18] : memref<2x3x256xf32, #tpu.memory_space<vmem>>, vector<1x1x256xf32>
    %29 = vector.shape_cast %28 : vector<1x1x256xf32> to vector<1x256xf32>
    %c4 = arith.constant 4 : index
    %30 = memref.load %arg1[%c4] : memref<9xf32, #tpu.memory_space<smem>>
    %31 = vector.broadcast %30 : f32 to vector<1x256xf32>
    %32 = arith.mulf %29, %31 : vector<1x256xf32>
    %33 = arith.addf %27, %32 : vector<1x256xf32>
    %c0_19 = arith.constant 0 : index
    %c2_20 = arith.constant 2 : index
    %c0_21 = arith.constant 0 : index
    %34 = vector.load %arg0[%c0_19, %c2_20, %c0_21] : memref<2x3x256xf32, #tpu.memory_space<vmem>>, vector<1x1x256xf32>
    %35 = vector.shape_cast %34 : vector<1x1x256xf32> to vector<1x256xf32>
    %c5 = arith.constant 5 : index
    %36 = memref.load %arg1[%c5] : memref<9xf32, #tpu.memory_space<smem>>
    %37 = vector.broadcast %36 : f32 to vector<1x256xf32>
    %38 = arith.mulf %35, %37 : vector<1x256xf32>
    %39 = arith.addf %33, %38 : vector<1x256xf32>
    %c1_22 = arith.constant 1 : index
    %40 = memref.load %arg2[%c1_22] : memref<3xf32, #tpu.memory_space<smem>>
    %41 = vector.broadcast %40 : f32 to vector<1x256xf32>
    %42 = arith.addf %39, %41 : vector<1x256xf32>
    %c0_23 = arith.constant 0 : index
    %c1_24 = arith.constant 1 : index
    %c0_25 = arith.constant 0 : index
    %43 = vector.load %arg3[%c0_23, %c1_24, %c0_25] : memref<2x3x256xf32, #tpu.memory_space<vmem>>, vector<1x1x256xf32>
    %44 = vector.shape_cast %43 : vector<1x1x256xf32> to vector<1x256xf32>
    %45 = vector.shape_cast %42 : vector<1x256xf32> to vector<1x1x256xf32>
    tpu.vector_store %arg3[%c0_23, %c1_24, %c0_25], %45 {strides = array<i32>} : memref<2x3x256xf32, #tpu.memory_space<vmem>>, vector<1x1x256xf32>,
    %c0_26 = arith.constant 0 : index
    %c0_27 = arith.constant 0 : index
    %c0_28 = arith.constant 0 : index
    %46 = vector.load %arg0[%c0_26, %c0_27, %c0_28] : memref<2x3x256xf32, #tpu.memory_space<vmem>>, vector<1x1x256xf32>
    %47 = vector.shape_cast %46 : vector<1x1x256xf32> to vector<1x256xf32>
    %c6 = arith.constant 6 : index
    %48 = memref.load %arg1[%c6] : memref<9xf32, #tpu.memory_space<smem>>
    %49 = vector.broadcast %48 : f32 to vector<1x256xf32>
    %50 = arith.mulf %47, %49 : vector<1x256xf32>
    %c0_29 = arith.constant 0 : index
    %c1_30 = arith.constant 1 : index
    %c0_31 = arith.constant 0 : index
    %51 = vector.load %arg0[%c0_29, %c1_30, %c0_31] : memref<2x3x256xf32, #tpu.memory_space<vmem>>, vector<1x1x256xf32>
    %52 = vector.shape_cast %51 : vector<1x1x256xf32> to vector<1x256xf32>
    %c7 = arith.constant 7 : index
    %53 = memref.load %arg1[%c7] : memref<9xf32, #tpu.memory_space<smem>>
    %54 = vector.broadcast %53 : f32 to vector<1x256xf32>
    %55 = arith.mulf %52, %54 : vector<1x256xf32>
    %56 = arith.addf %50, %55 : vector<1x256xf32>
    %c0_32 = arith.constant 0 : index
    %c2_33 = arith.constant 2 : index
    %c0_34 = arith.constant 0 : index
    %57 = vector.load %arg0[%c0_32, %c2_33, %c0_34] : memref<2x3x256xf32, #tpu.memory_space<vmem>>, vector<1x1x256xf32>
    %58 = vector.shape_cast %57 : vector<1x1x256xf32> to vector<1x256xf32>
    %c8 = arith.constant 8 : index
    %59 = memref.load %arg1[%c8] : memref<9xf32, #tpu.memory_space<smem>>
    %60 = vector.broadcast %59 : f32 to vector<1x256xf32>
    %61 = arith.mulf %58, %60 : vector<1x256xf32>
    %62 = arith.addf %56, %61 : vector<1x256xf32>
    %c2_35 = arith.constant 2 : index
    %63 = memref.load %arg2[%c2_35] : memref<3xf32, #tpu.memory_space<smem>>
    %64 = vector.broadcast %63 : f32 to vector<1x256xf32>
    %65 = arith.addf %62, %64 : vector<1x256xf32>
    %c0_36 = arith.constant 0 : index
    %c2_37 = arith.constant 2 : index
    %c0_38 = arith.constant 0 : index
    %66 = vector.load %arg3[%c0_36, %c2_37, %c0_38] : memref<2x3x256xf32, #tpu.memory_space<vmem>>, vector<1x1x256xf32>
    %67 = vector.shape_cast %66 : vector<1x1x256xf32> to vector<1x256xf32>
    %68 = vector.shape_cast %65 : vector<1x256xf32> to vector<1x1x256xf32>
    tpu.vector_store %arg3[%c0_36, %c2_37, %c0_38], %68 {strides = array<i32>} : memref<2x3x256xf32, #tpu.memory_space<vmem>>, vector<1x1x256xf32>,
    %c1_39 = arith.constant 1 : index
    %c0_40 = arith.constant 0 : index
    %c0_41 = arith.constant 0 : index
    %69 = vector.load %arg0[%c1_39, %c0_40, %c0_41] : memref<2x3x256xf32, #tpu.memory_space<vmem>>, vector<1x1x256xf32>
    %70 = vector.shape_cast %69 : vector<1x1x256xf32> to vector<1x256xf32>
    %c0_42 = arith.constant 0 : index
    %71 = memref.load %arg1[%c0_42] : memref<9xf32, #tpu.memory_space<smem>>
    %72 = vector.broadcast %71 : f32 to vector<1x256xf32>
    %73 = arith.mulf %70, %72 : vector<1x256xf32>
    %c1_43 = arith.constant 1 : index
    %c1_44 = arith.constant 1 : index
    %c0_45 = arith.constant 0 : index
    %74 = vector.load %arg0[%c1_43, %c1_44, %c0_45] : memref<2x3x256xf32, #tpu.memory_space<vmem>>, vector<1x1x256xf32>
    %75 = vector.shape_cast %74 : vector<1x1x256xf32> to vector<1x256xf32>
    %c1_46 = arith.constant 1 : index
    %76 = memref.load %arg1[%c1_46] : memref<9xf32, #tpu.memory_space<smem>>
    %77 = vector.broadcast %76 : f32 to vector<1x256xf32>
    %78 = arith.mulf %75, %77 : vector<1x256xf32>
    %79 = arith.addf %73, %78 : vector<1x256xf32>
    %c1_47 = arith.constant 1 : index
    %c2_48 = arith.constant 2 : index
    %c0_49 = arith.constant 0 : index
    %80 = vector.load %arg0[%c1_47, %c2_48, %c0_49] : memref<2x3x256xf32, #tpu.memory_space<vmem>>, vector<1x1x256xf32>
    %81 = vector.shape_cast %80 : vector<1x1x256xf32> to vector<1x256xf32>
    %c2_50 = arith.constant 2 : index
    %82 = memref.load %arg1[%c2_50] : memref<9xf32, #tpu.memory_space<smem>>
    %83 = vector.broadcast %82 : f32 to vector<1x256xf32>
    %84 = arith.mulf %81, %83 : vector<1x256xf32>
    %85 = arith.addf %79, %84 : vector<1x256xf32>
    %c0_51 = arith.constant 0 : index
    %86 = memref.load %arg2[%c0_51] : memref<3xf32, #tpu.memory_space<smem>>
    %87 = vector.broadcast %86 : f32 to vector<1x256xf32>
    %88 = arith.addf %85, %87 : vector<1x256xf32>
    %c1_52 = arith.constant 1 : index
    %c0_53 = arith.constant 0 : index
    %c0_54 = arith.constant 0 : index
    %89 = vector.load %arg3[%c1_52, %c0_53, %c0_54] : memref<2x3x256xf32, #tpu.memory_space<vmem>>, vector<1x1x256xf32>
    %90 = vector.shape_cast %89 : vector<1x1x256xf32> to vector<1x256xf32>
    %91 = vector.shape_cast %88 : vector<1x256xf32> to vector<1x1x256xf32>
    tpu.vector_store %arg3[%c1_52, %c0_53, %c0_54], %91 {strides = array<i32>} : memref<2x3x256xf32, #tpu.memory_space<vmem>>, vector<1x1x256xf32>,
    %c1_55 = arith.constant 1 : index
    %c0_56 = arith.constant 0 : index
    %c0_57 = arith.constant 0 : index
    %92 = vector.load %arg0[%c1_55, %c0_56, %c0_57] : memref<2x3x256xf32, #tpu.memory_space<vmem>>, vector<1x1x256xf32>
    %93 = vector.shape_cast %92 : vector<1x1x256xf32> to vector<1x256xf32>
    %c3_58 = arith.constant 3 : index
    %94 = memref.load %arg1[%c3_58] : memref<9xf32, #tpu.memory_space<smem>>
    %95 = vector.broadcast %94 : f32 to vector<1x256xf32>
    %96 = arith.mulf %93, %95 : vector<1x256xf32>
    %c1_59 = arith.constant 1 : index
    %c1_60 = arith.constant 1 : index
    %c0_61 = arith.constant 0 : index
    %97 = vector.load %arg0[%c1_59, %c1_60, %c0_61] : memref<2x3x256xf32, #tpu.memory_space<vmem>>, vector<1x1x256xf32>
    %98 = vector.shape_cast %97 : vector<1x1x256xf32> to vector<1x256xf32>
    %c4_62 = arith.constant 4 : index
    %99 = memref.load %arg1[%c4_62] : memref<9xf32, #tpu.memory_space<smem>>
    %100 = vector.broadcast %99 : f32 to vector<1x256xf32>
    %101 = arith.mulf %98, %100 : vector<1x256xf32>
    %102 = arith.addf %96, %101 : vector<1x256xf32>
    %c1_63 = arith.constant 1 : index
    %c2_64 = arith.constant 2 : index
    %c0_65 = arith.constant 0 : index
    %103 = vector.load %arg0[%c1_63, %c2_64, %c0_65] : memref<2x3x256xf32, #tpu.memory_space<vmem>>, vector<1x1x256xf32>
    %104 = vector.shape_cast %103 : vector<1x1x256xf32> to vector<1x256xf32>
    %c5_66 = arith.constant 5 : index
    %105 = memref.load %arg1[%c5_66] : memref<9xf32, #tpu.memory_space<smem>>
    %106 = vector.broadcast %105 : f32 to vector<1x256xf32>
    %107 = arith.mulf %104, %106 : vector<1x256xf32>
    %108 = arith.addf %102, %107 : vector<1x256xf32>
    %c1_67 = arith.constant 1 : index
    %109 = memref.load %arg2[%c1_67] : memref<3xf32, #tpu.memory_space<smem>>
    %110 = vector.broadcast %109 : f32 to vector<1x256xf32>
    %111 = arith.addf %108, %110 : vector<1x256xf32>
    %c1_68 = arith.constant 1 : index
    %c1_69 = arith.constant 1 : index
    %c0_70 = arith.constant 0 : index
    %112 = vector.load %arg3[%c1_68, %c1_69, %c0_70] : memref<2x3x256xf32, #tpu.memory_space<vmem>>, vector<1x1x256xf32>
    %113 = vector.shape_cast %112 : vector<1x1x256xf32> to vector<1x256xf32>
    %114 = vector.shape_cast %111 : vector<1x256xf32> to vector<1x1x256xf32>
    tpu.vector_store %arg3[%c1_68, %c1_69, %c0_70], %114 {strides = array<i32>} : memref<2x3x256xf32, #tpu.memory_space<vmem>>, vector<1x1x256xf32>,
    %c1_71 = arith.constant 1 : index
    %c0_72 = arith.constant 0 : index
    %c0_73 = arith.constant 0 : index
    %115 = vector.load %arg0[%c1_71, %c0_72, %c0_73] : memref<2x3x256xf32, #tpu.memory_space<vmem>>, vector<1x1x256xf32>
    %116 = vector.shape_cast %115 : vector<1x1x256xf32> to vector<1x256xf32>
    %c6_74 = arith.constant 6 : index
    %117 = memref.load %arg1[%c6_74] : memref<9xf32, #tpu.memory_space<smem>>
    %118 = vector.broadcast %117 : f32 to vector<1x256xf32>
    %119 = arith.mulf %116, %118 : vector<1x256xf32>
    %c1_75 = arith.constant 1 : index
    %c1_76 = arith.constant 1 : index
    %c0_77 = arith.constant 0 : index
    %120 = vector.load %arg0[%c1_75, %c1_76, %c0_77] : memref<2x3x256xf32, #tpu.memory_space<vmem>>, vector<1x1x256xf32>
    %121 = vector.shape_cast %120 : vector<1x1x256xf32> to vector<1x256xf32>
    %c7_78 = arith.constant 7 : index
    %122 = memref.load %arg1[%c7_78] : memref<9xf32, #tpu.memory_space<smem>>
    %123 = vector.broadcast %122 : f32 to vector<1x256xf32>
    %124 = arith.mulf %121, %123 : vector<1x256xf32>
    %125 = arith.addf %119, %124 : vector<1x256xf32>
    %c1_79 = arith.constant 1 : index
    %c2_80 = arith.constant 2 : index
    %c0_81 = arith.constant 0 : index
    %126 = vector.load %arg0[%c1_79, %c2_80, %c0_81] : memref<2x3x256xf32, #tpu.memory_space<vmem>>, vector<1x1x256xf32>
    %127 = vector.shape_cast %126 : vector<1x1x256xf32> to vector<1x256xf32>
    %c8_82 = arith.constant 8 : index
    %128 = memref.load %arg1[%c8_82] : memref<9xf32, #tpu.memory_space<smem>>
    %129 = vector.broadcast %128 : f32 to vector<1x256xf32>
    %130 = arith.mulf %127, %129 : vector<1x256xf32>
    %131 = arith.addf %125, %130 : vector<1x256xf32>
    %c2_83 = arith.constant 2 : index
    %132 = memref.load %arg2[%c2_83] : memref<3xf32, #tpu.memory_space<smem>>
    %133 = vector.broadcast %132 : f32 to vector<1x256xf32>
    %134 = arith.addf %131, %133 : vector<1x256xf32>
    %c1_84 = arith.constant 1 : index
    %c2_85 = arith.constant 2 : index
    %c0_86 = arith.constant 0 : index
    %135 = vector.load %arg3[%c1_84, %c2_85, %c0_86] : memref<2x3x256xf32, #tpu.memory_space<vmem>>, vector<1x1x256xf32>
    %136 = vector.shape_cast %135 : vector<1x1x256xf32> to vector<1x256xf32>
    %137 = vector.shape_cast %134 : vector<1x256xf32> to vector<1x1x256xf32>
    tpu.vector_store %arg3[%c1_84, %c2_85, %c0_86], %137 {strides = array<i32>} : memref<2x3x256xf32, #tpu.memory_space<vmem>>, vector<1x1x256xf32>,
    return
  }
}

</mosaic_0001>

<bundles_post_ra>
// kernel: tpu_custom_call.1
= control target key start
LH: loop header
LB: loop body
LE: loop exit
PB: predicated region body
PF: predicated region fallthrough
CT: control target
= control target key end

     0   :  { %8 = vsyncpa [#allocation3], 0  ;;  %s390_s0 = inlined_call_operand.vmem [shape: f32[2,3,256], index: 0, kind: input, shape index: {}]   ;;  %s391_s1 = inlined_call_operand.vmem [shape: f32[9], index: 1, kind: input, shape index: {}]   ;;  %s392_s2 = inlined_call_operand.vmem [shape: f32[3], index: 2, kind: input, shape index: {}]   ;;  %s393_s3 = inlined_call_operand.vmem [shape: f32[2,3,256], index: 3, kind: output, shape index: {}]  }
   0x1   :  { %s18_s14 = sshll.u32 %s391_s1, 4  ;;  %s19_s14 = int_to_ptr.vmem [resolvable:$true] %s18_s14 }
   0x2   :  { %9 = vsyncpa [#allocation5], 0  ;;  %s28_s17 = sshll.u32 %s392_s2, 4  ;;  %s213_s18 = scalar_lea.vmem %s19_s14, 16  ;;  %s29_s17 = int_to_ptr.vmem [resolvable:$true] %s28_s17 }
   0x3   :  { %p214_p0 = scmp.ne.s32.totalorder %s19_s14, %s213_s18  ;;  %p218_p1 = scmp.lt.s32.totalorder %s19_s14, %s19_s14 }
   0x4   :  { %p219_p2 = scmp.lt.s32.totalorder %s213_s18, %s213_s18 }
   0x6   :  { %p220_p3 = por %p219_p2, %p218_p1 }
   0x8   :  { %p221_p4 = pnand %p220_p3, %p214_p0 }
   0xa   :  { %224 = shalt.err (!%p221_p4)
}
   0xb   :  { %s241_s19 = smov [#allocation2]   ;;  %s225_s20 = scalar_lea.vmem %s29_s17, 16 }
   0xc   :  { %21 = dma.vmem_to_smem %s19_s14, 16, %s241_s19, [#allocation3]  }
   0xd   :  { %p226_p5 = scmp.ne.s32.totalorder %s29_s17, %s225_s20  ;;  %p230_p6 = scmp.lt.s32.totalorder %s29_s17, %s29_s17 }
   0xe   :  { %p231_p7 = scmp.lt.s32.totalorder %s225_s20, %s225_s20 }
  0x10   :  { %p232_p8 = por %p231_p7, %p230_p6 }
  0x12   :  { %p233_p9 = pnand %p232_p8, %p226_p5 }
  0x14   :  { %236 = shalt.err (!%p233_p9)
}
  0x15   :  { %s242_s1 = smov [#allocation4]  }
  0x16   :  { %31 = dma.vmem_to_smem %s29_s17, 16, %s242_s1, [#allocation5]  }
  0x17   :  { %237 = dma.done.wait [#allocation3], 16  }
  0x18   :  { %238 = vsyncadd [#allocation3], 4294967280 }
  0x19   :  { %239 = dma.done.wait [#allocation5], 16  }
  0x1a   :  { %240 = vsyncadd [#allocation5], 4294967280 }
  0x1b   :  { %38 = sfence }
  0x1c   :  { %s40_s2 = sld [smem:[#allocation2]]  ;;  %v39_v0 = vld [vmem:[%s390_s0] ss:$4 sm:$0x3]  ;;  %v58_v4 = vlaneseq }
  0x1d   :  { %s269_s21 = sld [smem:[#allocation2 + $0x1]]  ;;  %v171_v1 = vld [vmem:[%s390_s0 + $0x1] ss:$4 sm:$0x3] }
  0x1e   :  { %s271_s22 = sld [smem:[#allocation2 + $0x2]]  ;;  %v173_v2 = vld [vmem:[%s390_s0 + $0x2] ss:$4 sm:$0x3]  ;;  %vm310_vm0 = vcmp.lt.s32.totalorder %v58_v4, 256 }
  0x1f   :  { %s276_s25 = sld [smem:[#allocation4]]  ;;  %v63_v5 = vld [vmem:[%s390_s0] ss:$4 sm:$0x3] }
  0x20   :  { %s281_s28 = sld [smem:[#allocation2 + $0x3]]  ;;  %v176_v8 = vld [vmem:[%s390_s0 + $0x1] ss:$4 sm:$0x3] }
  0x21   :  { %s286_s4 = sld [smem:[#allocation2 + $0x4]]  ;;  %v178_v11 = vld [vmem:[%s390_s0 + $0x2] ss:$4 sm:$0x3] }
  0x22   :  { %v41_v3 = vstv %s40_s2  ;;  %s291_s7 = sld [smem:[#allocation2 + $0x5]]  ;;  %v189_v13 = vld [vmem:[%s390_s0 + $0x8] ss:$4 sm:$0x3] }
  0x23   :  { %v42_v6 = vmul.f32 %v41_v3, %v39_v0  ;;  %v46_v7 = vstv %s269_s21  ;;  %s297_s10 = sld [smem:[#allocation4 + $0x1]]  ;;  %v82_v17 = vld [vmem:[%s390_s0] ss:$4 sm:$0x3]  ;;  %v105_v18 = vmul.f32 %v189_v13, %v41_v3 }
  0x24   :  { %v47_v9 = vmul.f32 %v171_v1, %v46_v7  ;;  %v52_v10 = vstv %s271_s22  ;;  %s303_s13 = sld [smem:[#allocation2 + $0x6]]  ;;  %v190_v19 = vld [vmem:[%s390_s0 + $0x9] ss:$4 sm:$0x3] }
  0x25   :  { %v53_v12 = vmul.f32 %v173_v2, %v52_v10  ;;  %s305_s14 = sld [smem:[#allocation2 + $0x7]]  ;;  %v56_v20 = vstv %s276_s25  ;;  %v110_v23 = vmul.f32 %v190_v19, %v46_v7  ;;  %v192_v24 = vld [vmem:[%s390_s0 + $0xa] ss:$4 sm:$0x3] }
  0x26   :  { %v48_v14 = vadd.f32 %v47_v9, %v42_v6  ;;  %v65_v16 = vstv %s281_s28  ;;  %s318_s19 = sld [smem:[#allocation2 + $0x8]]  ;;  %v116_v28 = vmul.f32 %v192_v24, %v52_v10  ;;  %v195_v29 = vld [vmem:[%s390_s0 + $0x8] ss:$4 sm:$0x3] }
  0x27   :  { %v66_v21 = vmul.f32 %v65_v16, %v63_v5  ;;  %v69_v22 = vstv %s286_s4  ;;  %s325_s2 = sld [smem:[#allocation4 + $0x2]]  ;;  %v197_v30 = vld [vmem:[%s390_s0 + $0x9] ss:$4 sm:$0x3]  ;;  %v111_v34 = vadd.f32 %v110_v23, %v105_v18  ;;  %v126_v35 = vmul.f32 %v195_v29, %v65_v16 }
  0x28   :  { %v54_v25 = vadd.f32 %v53_v12, %v48_v14  ;;  %v70_v26 = vmul.f32 %v176_v8, %v69_v22  ;;  %v74_v27 = vstv %s291_s7  ;;  %v183_v33 = vld [vmem:[%s390_s0 + $0x1] ss:$4 sm:$0x3]  ;;  %v199_v36 = vld [vmem:[%s390_s0 + $0xa] ss:$4 sm:$0x3]  ;;  %v130_v41 = vmul.f32 %v197_v30, %v69_v22 }
  0x29   :  { %v75_v31 = vmul.f32 %v178_v11, %v74_v27  ;;  %v78_v32 = vstv %s297_s10  ;;  %v185_v40 = vld [vmem:[%s390_s0 + $0x2] ss:$4 sm:$0x3]  ;;  %v203_v42 = vld [vmem:[%s390_s0 + $0x8] ss:$4 sm:$0x3]  ;;  %v117_v45 = vadd.f32 %v116_v28, %v111_v34  ;;  %v135_v46 = vmul.f32 %v199_v36, %v74_v27 }
  0x2a   :  { %v57_v37 = vadd.f32 %v56_v20, %v54_v25  ;;  %v71_v38 = vadd.f32 %v70_v26, %v66_v21  ;;  %v84_v39 = vstv %s303_s13  ;;  %v205_v47 = vld [vmem:[%s390_s0 + $0x9] ss:$4 sm:$0x3]  ;;  %v131_v51 = vadd.f32 %v130_v41, %v126_v35  ;;  %v207_v52 = vld [vmem:[%s390_s0 + $0xa] ss:$4 sm:$0x3] }
  0x2b   :  { %v85_v43 = vmul.f32 %v84_v39, %v82_v17  ;;  %v88_v44 = vstv %s305_s14  ;;  %v120_v54 = vadd.f32 %v117_v45, %v56_v20  ;;  %v145_v55 = vmul.f32 %v203_v42, %v84_v39 }
  0x2c   :  { %62 = vst.msk [vmem:[%s393_s3] ss:$4 sm:$0x3] %vm310_vm0, %v57_v37  ;;  %v76_v48 = vadd.f32 %v75_v31, %v71_v38  ;;  %v89_v49 = vmul.f32 %v183_v33, %v88_v44  ;;  %v93_v50 = vstv %s318_s19  ;;  %v136_v58 = vadd.f32 %v135_v46, %v131_v51 }
  0x2d   :  { %v94_v53 = vmul.f32 %v185_v40, %v93_v50  ;;  %v149_v59 = vmul.f32 %v205_v47, %v88_v44  ;;  %v97_v60 = vstv %s325_s2  ;;  %194 = vst.msk [vmem:[%s393_s3 + $0x8] ss:$4 sm:$0x3] %vm310_vm0, %v120_v54  ;;  %v154_v61 = vmul.f32 %v207_v52, %v93_v50 }
  0x2e   :  { %v79_v56 = vadd.f32 %v78_v32, %v76_v48  ;;  %v90_v57 = vadd.f32 %v89_v49, %v85_v43  ;;  %v139_v63 = vadd.f32 %v136_v58, %v78_v32 }
  0x2f   :  { %v150_v0 = vadd.f32 %v149_v59, %v145_v55 }
  0x30   :  { %181 = vst.msk [vmem:[%s393_s3 + $0x1] ss:$4 sm:$0x3] %vm310_vm0, %v79_v56  ;;  %v95_v62 = vadd.f32 %v94_v53, %v90_v57  ;;  %202 = vst.msk [vmem:[%s393_s3 + $0x9] ss:$4 sm:$0x3] %vm310_vm0, %v139_v63 }
  0x31   :  { %v155_v2 = vadd.f32 %v154_v61, %v150_v0 }
  0x32   :  { %v98_v1 = vadd.f32 %v97_v60, %v95_v62 }
  0x33   :  { %v158_v3 = vadd.f32 %v155_v2, %v97_v60 }
  0x34   :  { %188 = vst.msk [vmem:[%s393_s3 + $0x2] ss:$4 sm:$0x3] %vm310_vm0, %v98_v1 }
  0x35   :  { %210 = vst.msk [vmem:[%s393_s3 + $0xa] ss:$4 sm:$0x3] %vm310_vm0, %v158_v3 }
  0x36   :  { %165 = vsyncpa [#allocation3], 1 }
  0x37   :  { %166 = vsyncpa [#allocation5], 1 }

</bundles_post_ra>
